<compile_context>
chip_gen: v7x
topology: tpu7x:2x2x1
jax: 0.10.0
libtpu: 0.0.40
codegen_flags: <defaults>
</compile_context>

<pallas_src>
import functools

import numpy as np
import jax
import jax.numpy as jnp
from jax.experimental import pallas as pl
from jax.experimental.pallas import tpu as pltpu

_VMEM = pl.BlockSpec(memory_space=pltpu.MemorySpace.VMEM)


# ----------------------------- geometry helpers -----------------------------

def _round_up(x, m):
    return (x + m - 1) // m * m


def _geom(H, W):
    """Per-batch padded-flat geometry for an (H, W) feature map."""
    Hp, Wp = H + 2, W + 2
    margin = Wp + 1                                   # max |lane shift| of a 3x3 tap
    Sb = _round_up(Hp * Wp + 2 * margin, 128)         # lane-dense per-batch width
    return Hp, Wp, margin, Sb


@functools.lru_cache(maxsize=None)
def _interior_mask_np(H, W):
    Hp, Wp, m, Sb = _geom(H, W)
    g = np.zeros((Hp, Wp), np.float32)
    g[1:Hp - 1, 1:Wp - 1] = 1.0
    mk = np.zeros((1, Sb), np.float32)
    mk[0, m:m + Hp * Wp] = g.reshape(-1)
    return mk


def _interior_mask(H, W):
    return jnp.asarray(_interior_mask_np(H, W))


@functools.lru_cache(maxsize=None)
def _roll_shift_sign():
    """Probe pltpu.roll's shift convention once on device.

    Returns s such that pltpu.roll(x, (s*off) % n, axis)[i] == x[(i+off) % n].
    """
    def k(x_ref, o_ref):
        o_ref[...] = pltpu.roll(x_ref[...], 1, 1)

    x = jnp.broadcast_to(jnp.arange(128, dtype=jnp.float32), (8, 128))
    y = pl.pallas_call(
        k, out_shape=jax.ShapeDtypeStruct((8, 128), jnp.float32),
        in_specs=[_VMEM], out_specs=_VMEM,
    )(x)
    # jnp.roll semantics -> y[0,0] == 127 ; opposite convention -> y[0,0] == 1
    return -1 if float(y[0, 0]) > 64.0 else 1


def to_flat(x):
    """(C, B, H, W) dense -> (C, B*Sb) padded-flat (keeps dtype)."""
    C, B, H, W = x.shape
    Hp, Wp, m, Sb = _geom(H, W)
    xp = jnp.pad(x, ((0, 0), (0, 0), (1, 1), (1, 1)))            # conv zero padding
    xf = xp.reshape(C, B, Hp * Wp)
    xf = jnp.pad(xf, ((0, 0), (0, 0), (m, Sb - m - Hp * Wp)))    # margins / lane align
    return xf.reshape(C, B * Sb)


def from_flat(xf, B, H, W):
    """(C, B*Sb) padded-flat -> (C, B, H, W) dense."""
    Hp, Wp, m, Sb = _geom(H, W)
    C = xf.shape[0]
    xc = xf.reshape(C, B, Sb)[:, :, m:m + Hp * Wp].reshape(C, B, Hp, Wp)
    return xc[:, :, 1:1 + H, 1:1 + W]


def pooled_to_flat(ymax_flat, B, H, W):
    """Take the in-kernel 2x2-window-max map at geometry (H, W), keep windows
    anchored at even pixels, and re-lay it out as the (H//2, W//2) flat input.
    TODO(synk): this stride-2 decimation + re-pad stays as one fused XLA
    slice/pad chain; a strided lane scatter has no clean Pallas form here."""
    Hp, Wp, m, Sb = _geom(H, W)
    C = ymax_flat.shape[0]
    g = ymax_flat.reshape(C, B, Sb)[:, :, m:m + Hp * Wp].reshape(C, B, Hp, Wp)
    pooled = g[:, :, 1:1 + H:2, 1:1 + W:2]                       # (C, B, H/2, W/2)
    return to_flat(pooled)


# ----------------------------- Pallas kernels -----------------------------

def _dconv_kernel(*refs, n_x, Wp, has_head, pool, mask_out, shift_sign):
    """Fused double_conv (+ skip-sum prologue, + optional 1x1 head, + optional
    2x2 window max for the following max-pool).

    refs = (x_0..x_{n_x-1}, mask, w1_0..w1_{n_x-1}, b1, w2, b2,
            [wh, bh], out, [out_pool])
    x_i : (Ci, S) padded-flat block.     w* : (9, Co, Ci) bf16 tap-major.
    b*  : (Co, 1) f32.                   mask : (1, S) f32 interior mask.
    """
    xs = refs[:n_x]
    mask_ref = refs[n_x]
    w1_refs = refs[n_x + 1:2 * n_x + 1]
    b1_ref, w2_ref, b2_ref = refs[2 * n_x + 1:2 * n_x + 4]
    pos = 2 * n_x + 4
    if has_head:
        wh_ref, bh_ref = refs[pos:pos + 2]
        pos += 2
    o_ref = refs[pos]
    pool_ref = refs[pos + 1] if pool else None

    S = xs[0].shape[-1]
    mask = mask_ref[...]                                        # (1, S) f32
    cmid = w2_ref.shape[2]
    cout = w2_ref.shape[1]

    offs = tuple(dh * Wp + dw for dh in (-1, 0, 1) for dw in (-1, 0, 1))

    def shifted(z, off):
        # lane-roll neighbor gather in the padded-flat layout (VMEM only, XLU)
        return pltpu.roll(z, (shift_sign * off) % S, 1) if off else z

    def conv_accum(zs, w_refs):
        # 3x3 conv as 9 small MXU matmuls per input, accumulated in f32.
        # Activations are cast to bf16 ONCE before tap construction (perf
        # review): rolls touch half the vregs and there is no (9C, S) patch
        # buffer / sublane concat at all.
        acc = None
        for z, w_ref in zip(zs, w_refs):
            zb = z.astype(jnp.bfloat16)
            for t, off in enumerate(offs):
                d = jnp.dot(w_ref[t], shifted(zb, off),
                            preferred_element_type=jnp.float32)
                acc = d if acc is None else acc + d
        return acc

    # hoisted mask broadcast (JAX does not CSE broadcast_in_dim)
    maskb = jnp.broadcast_to(mask, (cmid, S))

    y1 = jnp.maximum(conv_accum([x[...] for x in xs], w1_refs) + b1_ref[...], 0.0)
    y1 = y1 * maskb                                   # zero pad border / margins

    y2 = jnp.maximum(conv_accum([y1], [w2_ref]) + b2_ref[...], 0.0)
    if mask_out:                                      # only needed when this
        y2 = y2 * (maskb if cout == cmid              # output is reused as a
                   else jnp.broadcast_to(mask, (cout, S)))  # same-geometry skip

    if has_head:                                      # fused 1x1 output conv
        o_ref[...] = (jnp.dot(wh_ref[...], y2.astype(jnp.bfloat16),
                              preferred_element_type=jnp.float32)
                      + bh_ref[...]).astype(o_ref.dtype)
    else:
        y2c = y2.astype(o_ref.dtype)                  # bf16 inter-stage transport
        o_ref[...] = y2c
        if pool:
            # fused 2x2 window max of the following MaxPool2d(2); the stride-2
            # decimation happens outside (pooled_to_flat).
            m0 = jnp.maximum(y2c, shifted(y2c, 1))
            m1 = jnp.maximum(shifted(y2c, Wp), shifted(y2c, Wp + 1))
            pool_ref[...] = jnp.maximum(m0, m1)


def _upconv_kernel(x_ref, w_ref, b_ref, o_ref):
    # ConvTranspose2d(k=2, s=2): outputs never overlap -> one matmul producing
    # the 4 (kh, kw) phases stacked along the sublane axis.
    y = jnp.dot(w_ref[...], x_ref[...],
                preferred_element_type=jnp.float32) + b_ref[...]
    o_ref[...] = y.astype(o_ref.dtype)


# ----------------------------- stage wrappers -----------------------------

def _taps_w(w):
    """HWIO (3,3,ci,co) -> (9, co, ci) bf16, tap-major (kh, kw)."""
    co, ci = w.shape[3], w.shape[2]
    return jnp.transpose(w, (0, 1, 3, 2)).reshape(9, co, ci).astype(jnp.bfloat16)


def double_conv_flat(xs, B, H, W, p, head=None, pool=False, mask_out=True):
    """Fused double_conv on padded-flat inputs.

    xs   : list of (Ci, B*Sb) arrays (Up stages pass [skip, upsampled]).
    head : optional (w, b) of the final 1x1 conv, fused into the same kernel.
    pool : also emit the 2x2-window-max map (encoder stages).
    """
    Hp, Wp, m, Sb = _geom(H, W)

    # sublane-align every concat member (only the n_channels=1 input needs it)
    w1 = p["w1"]                                             # HWIO (3,3,Cin,Cmid)
    sizes = [int(x.shape[0]) for x in xs]
    w1_blocks = (jnp.split(w1, np.cumsum(sizes)[:-1].tolist(), axis=2)
                 if len(xs) > 1 else [w1])
    xs_p, w1_list = [], []
    for x, wb in zip(xs, w1_blocks):
        pad = (-x.shape[0]) % 8
        if pad:
            x = jnp.pad(x, ((0, pad), (0, 0)))
            wb = jnp.pad(wb, ((0, 0), (0, 0), (0, pad), (0, 0)))
        xs_p.append(x)
        w1_list.append(_taps_w(wb))

    cmid = int(p["w1"].shape[-1])
    cout = int(p["w2"].shape[-1])

    # Batch -> lane merge policy (perf review): fully merge batches onto the
    # lane axis at the deep/narrow stages (full MXU N on v6e, one grid step),
    # keep a 2-way "parallel" grid over batch where each block is still wide
    # enough (>= 256 lanes) so v7x's two TensorCores both get work.
    n_blk = 2 if (B > 1 and B % 2 == 0 and (B // 2) * Sb >= 256) else 1
    Bm = B // n_blk
    lane = Bm * Sb

    mask = jnp.tile(_interior_mask(H, W), (1, Bm))

    operands = (xs_p + [mask] + w1_list +
                [p["b1"].reshape(cmid, 1), _taps_w(p["w2"]),
                 p["b2"].reshape(cout, 1)])

    has_head = head is not None
    out_c = cout
    if has_head:
        wh, bh = head                         # (Cout_prev, n_classes), (n_classes,)
        ncls = wh.shape[-1]
        out_c = _round_up(ncls, 8)            # keep output sublane-aligned
        operands += [jnp.pad(wh.T, ((0, out_c - ncls), (0, 0))).astype(jnp.bfloat16),
                     jnp.pad(bh.reshape(ncls, 1), ((0, out_c - ncls), (0, 0)))]

    in_specs = [pl.BlockSpec((int(x.shape[0]), lane), lambda b: (0, b))
                for x in xs_p]
    # grid-invariant operands (mask / weights / biases)
    # TODO(synk): mark these pipeline_mode=pl.Buffered(1) once lane tiling /
    # large channel counts are in play (reclaims the duplicate buffer under
    # v7x's 64 MiB VMEM).
    in_specs += [pl.BlockSpec(op.shape, lambda b, _nd=op.ndim: (0,) * _nd)
                 for op in operands[len(xs_p):]]

    out_specs = [pl.BlockSpec((out_c, lane), lambda b: (0, b))]
    out_shapes = [jax.ShapeDtypeStruct((out_c, B * Sb), jnp.bfloat16)]
    if pool:
        out_specs.append(pl.BlockSpec((cout, lane), lambda b: (0, b)))
        out_shapes.append(jax.ShapeDtypeStruct((cout, B * Sb), jnp.bfloat16))

    kernel = functools.partial(
        _dconv_kernel, n_x=len(xs_p), Wp=Wp, has_head=has_head,
        pool=pool, mask_out=mask_out, shift_sign=_roll_shift_sign())

    return pl.pallas_call(
        kernel,
        grid=(n_blk,),
        in_specs=in_specs,
        out_specs=tuple(out_specs) if pool else out_specs[0],
        out_shape=tuple(out_shapes) if pool else out_shapes[0],
        compiler_params=pltpu.CompilerParams(
            dimension_semantics=("parallel",),
            vmem_limit_bytes=64 * 1024 * 1024),
    )(*operands)


def conv_transpose2x2(x_flat, B, H, W, w, bias):
    """ConvTranspose2d(Cin, Cout, 2, 2) on a padded-flat input at geometry
    (H, W).  Returns a dense (Cout, B, 2H, 2W) bf16 tensor.  w: (2,2,Cin,Cout)."""
    Cin = x_flat.shape[0]
    Cout = w.shape[-1]
    N = B * H * W
    xl = from_flat(x_flat, B, H, W).reshape(Cin, N).astype(jnp.bfloat16)
    wt = w.transpose(0, 1, 3, 2).reshape(4 * Cout, Cin).astype(jnp.bfloat16)
    bt = jnp.tile(bias, 4).reshape(4 * Cout, 1)

    if N < 128:
        # Tiny decoder levels: a pallas_call here is pure launch overhead with
        # masked lane stores (perf review) -> plain XLA matmul.
        out = (jnp.dot(wt, xl, preferred_element_type=jnp.float32)
               + bt).astype(jnp.bfloat16)
    else:
        tile = 512 if (N % 512 == 0 and N >= 1024) else N     # lane grid when big
        out = pl.pallas_call(
            _upconv_kernel,
            grid=(N // tile,),
            in_specs=[pl.BlockSpec((Cin, tile), lambda j: (0, j)),
                      pl.BlockSpec((4 * Cout, Cin), lambda j: (0, 0)),
                      pl.BlockSpec((4 * Cout, 1), lambda j: (0, 0))],
            out_specs=pl.BlockSpec((4 * Cout, tile), lambda j: (0, j)),
            out_shape=jax.ShapeDtypeStruct((4 * Cout, N), jnp.bfloat16),
            compiler_params=pltpu.CompilerParams(
                dimension_semantics=("parallel",),
                vmem_limit_bytes=64 * 1024 * 1024),
        )(xl, wt, bt)

    # TODO(synk): the strided 4-phase spatial interleave stays as one fused XLA
    # reshape/transpose; storing straight into the next stage's flat layout
    # would need a strided lane scatter with no clean Pallas form here.
    out = out.reshape(2, 2, Cout, B, H, W)
    out = out.transpose(2, 3, 4, 0, 5, 1).reshape(Cout, B, 2 * H, 2 * W)
    return out


# ----------------------------- model composition -----------------------------

def unet_forward(x_nchw, params):
    B, _, H, W = x_nchw.shape
    x = jnp.transpose(x_nchw, (1, 0, 2, 3))                 # (C, B, H, W)

    # encoder: each stage also emits its fused 2x2 window-max map
    x1, x1m = double_conv_flat([to_flat(x)], B, H, W, params["inc"], pool=True)
    h2, w2 = H // 2, W // 2
    x2, x2m = double_conv_flat([pooled_to_flat(x1m, B, H, W)], B, h2, w2,
                               params["down1"], pool=True)
    h3, w3 = h2 // 2, w2 // 2
    x3, x3m = double_conv_flat([pooled_to_flat(x2m, B, h2, w2)], B, h3, w3,
                               params["down2"], pool=True)
    h4, w4 = h3 // 2, w3 // 2
    x4 = double_conv_flat([pooled_to_flat(x3m, B, h3, w3)], B, h4, w4,
                          params["down3"])
    xb = double_conv_flat([x4], B, h4, w4, params["bottleneck"], mask_out=False)

    # decoder (matches Up.forward: upsample, F.pad-style pad/crop, concat, conv)
    def up(x1_flat, hw1, x2_flat, hw2, p, head=None):
        (ha, wa), (hb, wb) = hw1, hw2
        u = conv_transpose2x2(x1_flat, B, ha, wa, p["up_w"], p["up_b"])
        dY, dX = hb - u.shape[2], wb - u.shape[3]
        u = jax.lax.pad(u, jnp.zeros((), u.dtype),
                        ((0, 0, 0), (0, 0, 0),
                         (dY // 2, dY - dY // 2, 0), (dX // 2, dX - dX // 2, 0)))
        return double_conv_flat([x2_flat, to_flat(u)], B, hb, wb, p,
                                head=head, mask_out=False)

    y = up(xb, (h4, w4), x4, (h4, w4), params["up1"])
    y = up(y, (h4, w4), x3, (h3, w3), params["up2"])
    y = up(y, (h3, w3), x2, (h2, w2), params["up3"])
    y = up(y, (h2, w2), x1, (H, W), params["up4"],
           head=(params["outc_w"], params["outc_b"]))        # 1x1 conv fused

    n_classes = params["outc_w"].shape[-1]
    logits = from_flat(y, B, H, W)[:n_classes]               # (n_classes, B, H, W)
    return jnp.transpose(logits, (1, 0, 2, 3)).astype(jnp.float32)   # NCHW


# ----------------------------- parameter init -----------------------------

def init_params(key, n_channels=1, n_classes=1, nf=8):
    keys = iter(jax.random.split(key, 64))

    def conv_p(cin, cout, k):
        bound = 1.0 / np.sqrt(cin * k * k)
        w = jax.random.uniform(next(keys), (k, k, cin, cout), jnp.float32, -bound, bound)
        b = jax.random.uniform(next(keys), (cout,), jnp.float32, -bound, bound)
        return w, b

    def dc(cin, cout):
        w1, b1 = conv_p(cin, cout, 3)
        w2, b2 = conv_p(cout, cout, 3)
        return dict(w1=w1, b1=b1, w2=w2, b2=b2)

    def up_p(cin, cout):
        chalf = cin // 2
        uw, ub = conv_p(cin, chalf, 2)   # ConvTranspose2d(cin, cin//2, 2, 2)
        d = dc(cin, cout)
        d.update(up_w=uw, up_b=ub)
        return d

    params = dict(
        inc=dc(n_channels, nf),
        down1=dc(nf, nf * 2),
        down2=dc(nf * 2, nf * 4),
        down3=dc(nf * 4, nf * 8),
        bottleneck=dc(nf * 8, nf * 16),
        up1=up_p(nf * 16, nf * 8),
        up2=up_p(nf * 8, nf * 4),
        up3=up_p(nf * 4, nf * 2),
        up4=up_p(nf * 2, nf),
    )
    ow, ob = conv_p(nf, n_classes, 1)
    params["outc_w"] = ow.reshape(nf, n_classes)
    params["outc_b"] = ob
    return params


# ----------------------------- pure-JAX reference -----------------------------

def _conv3x3_ref(x, w, b, relu=True):
    y = jax.lax.conv_general_dilated(
        x, w, (1, 1), ((1, 1), (1, 1)),
        dimension_numbers=("NHWC", "HWIO", "NHWC")) + b
    return jnp.maximum(y, 0.0) if relu else y


def _maxpool_ref(x):
    return jnp.maximum(jnp.maximum(x[:, 0::2, 0::2, :], x[:, 0::2, 1::2, :]),
                       jnp.maximum(x[:, 1::2, 0::2, :], x[:, 1::2, 1::2, :]))


def _upconv_ref(x, w, b):
    B, H, W, Cin = x.shape
    Cout = w.shape[-1]
    y = jnp.einsum("bhwc,ijcd->bhiwjd", x, w).reshape(B, 2 * H, 2 * W, Cout)
    return y + b


def unet_forward_ref(x_nchw, params):
    x = jnp.transpose(x_nchw, (0, 2, 3, 1))

    def dc(x, p):
        return _conv3x3_ref(_conv3x3_ref(x, p["w1"], p["b1"]), p["w2"], p["b2"])

    def up(x1, x2, p):
        xu = _upconv_ref(x1, p["up_w"], p["up_b"])
        dY = x2.shape[1] - xu.shape[1]
        dX = x2.shape[2] - xu.shape[2]
        xu = jax.lax.pad(xu, jnp.array(0.0, xu.dtype),
                         ((0, 0, 0), (dY // 2, dY - dY // 2, 0),
                          (dX // 2, dX - dX // 2, 0), (0, 0, 0)))
        return dc(jnp.concatenate([x2, xu], axis=-1), p)

    x1 = dc(x, params["inc"])
    x2 = dc(_maxpool_ref(x1), params["down1"])
    x3 = dc(_maxpool_ref(x2), params["down2"])
    x4 = dc(_maxpool_ref(x3), params["down3"])
    xb = dc(x4, params["bottleneck"])
    y = up(xb, x4, params["up1"])
    y = up(y, x3, params["up2"])
    y = up(y, x2, params["up3"])
    y = up(y, x1, params["up4"])
    logits = jnp.einsum("bhwc,cd->bhwd", y, params["outc_w"]) + params["outc_b"]
    return jnp.transpose(logits, (0, 3, 1, 2))


# ----------------------------- main -----------------------------

if __name__ == "__main__":
    key = jax.random.PRNGKey(0)
    pkey, xkey = jax.random.split(key)

    # Small shapes consistent with UNet(n_channels=1, n_classes=1, n_filters=8)
    params = init_params(pkey, n_channels=1, n_classes=1, nf=8)
    x = jax.random.normal(xkey, (2, 1, 16, 16), jnp.float32)  # NCHW, like PyTorch

    _roll_shift_sign()  # prime the (cached) roll-convention probe before jit

    out = jax.jit(unet_forward)(x, params)
    out = jax.block_until_ready(out)
    assert out.shape == (2, 1, 16, 16), out.shape

    ref = unet_forward_ref(x, params)
    err = float(jnp.max(jnp.abs(out - ref)))
    scale = max(1.0, float(jnp.max(jnp.abs(ref))))
    # tolerance covers bf16 matmul operands + bf16 inter-stage activations
    assert err <= 6e-2 * scale, f"mismatch vs reference: max abs err = {err}"

    print("KERNEL_OK")
</pallas_src>

<mosaic_0001>
module attributes {stable_mosaic.version = 11 : i64} {
  func.func @k(%arg0: memref<8x128xf32, #tpu.memory_space<vmem>>, %arg1: memref<8x128xf32, #tpu.memory_space<vmem>>) attributes {dimension_semantics = [], scalar_prefetch = 0 : i64, scratch_operands = 0 : i64, tpu.core_type = #tpu.core_type<tc>} {
    %c0 = arith.constant 0 : index
    %c0_0 = arith.constant 0 : index
    %0 = vector.load %arg0[%c0, %c0_0] : memref<8x128xf32, #tpu.memory_space<vmem>>, vector<8x128xf32>
    %c1_i32 = arith.constant 1 : i32
    %1 = tpu.dynamic_rotate %0 by %c1_i32 dim 1 : vector<8x128xf32>, i32 -> vector<8x128xf32>
    %c0_1 = arith.constant 0 : index
    %c0_2 = arith.constant 0 : index
    %2 = vector.load %arg1[%c0_1, %c0_2] : memref<8x128xf32, #tpu.memory_space<vmem>>, vector<8x128xf32>
    tpu.vector_store %arg1[%c0_1, %c0_2], %1 {strides = array<i32>} : memref<8x128xf32, #tpu.memory_space<vmem>>, vector<8x128xf32>,
    return
  }
}

</mosaic_0001>

<bundles_post_ra>
// kernel: tpu_custom_call.1
= control target key start
LH: loop header
LB: loop body
LE: loop exit
PB: predicated region body
PF: predicated region fallthrough
CT: control target
= control target key end

     0   :  { %6 = vsyncpa [#allocation3], 0  ;;  %s128_s0 = inlined_call_operand.hbm [shape: f32[8,128], index: 0, kind: input, shape index: {}]   ;;  %s129_s1 = inlined_call_operand.hbm [shape: f32[8,128], index: 1, kind: output, shape index: {}]  }
   0x1   :  { %7 = vsyncpa [#allocation4], 0  ;;  %s91_s6 = smov [#allocation2]   ;;  %s43_s10 = scalar_lea.hbm %s128_s0, 128 }
   0x2   :  { %s14_s7 = sshll.u32 %s91_s6, 4  ;;  %p44_p0 = scmp.ne.s32.totalorder %s128_s0, %s43_s10  ;;  %s15_s7 = int_to_ptr.vmem [resolvable:$true] %s14_s7 }
   0x3   :  { %p47_p1 = scmp.lt.u32.totalorder %s43_s10, %s128_s0 }
   0x5   :  { %p49_p2 = pnand %p47_p1, %p44_p0 }
   0x7   :  { %52 = shalt.err (!%p49_p2)
}
   0x8   :  { %s53_s15 = scalar_lea.vmem %s15_s7, 128  ;;  %p58_p4 = scmp.lt.s32.totalorder %s15_s7, %s15_s7 }
   0x9   :  { %p54_p3 = scmp.ne.s32.totalorder %s15_s7, %s53_s15  ;;  %p59_p5 = scmp.lt.s32.totalorder %s53_s15, %s53_s15 }
   0xb   :  { %p60_p6 = por %p59_p5, %p58_p4 }
   0xd   :  { %p61_p7 = pnand %p60_p6, %p54_p3 }
   0xf   :  { %64 = shalt.err (!%p61_p7)
}
  0x10   :  { %17 = dma.hbm_to_vmem [thread:$0]  %s128_s0, 128, %s15_s7, [#allocation3]  }
  0x11   :  { %87 = dma.done.wait [#allocation3], 128  }
  0x12   :  { %88 = vsyncadd [#allocation3], 4294967168  ;;  %v21_v0 = vld [vmem:[#allocation2] sm:$0xff]  ;;  %s92_s18 = smov 1   ;;  %s93_s19 = smov [#allocation5]  }
  0x13   :  { %22 = vrot.lane.b32.xlu0 %v21_v0, %s92_s18  ;;  %s31_s20 = sshll.u32 %s93_s19, 4  ;;  %s32_s20 = int_to_ptr.vmem [resolvable:$true] %s31_s20 }
  0x14   :  { %s65_s21 = scalar_lea.vmem %s32_s20, 128  ;;  %p70_p9 = scmp.lt.s32.totalorder %s32_s20, %s32_s20 }
  0x15   :  { %p66_p8 = scmp.ne.s32.totalorder %s32_s20, %s65_s21  ;;  %p71_p10 = scmp.lt.s32.totalorder %s65_s21, %s65_s21 }
  0x17   :  { %p72_p11 = por %p71_p10, %p70_p9 }
  0x19   :  { %p73_p12 = pnand %p72_p11, %p66_p8 }
  0x85   :  { %v23_v1 = vpop.permute.xlu0 %22 }
  0x86   :  { %24 = vst [vmem:[#allocation5] sm:$0xff] %v23_v1 }
  0x87   :  { %76 = shalt.err (!%p73_p12)
}
  0x88   :  { %s77_s0 = scalar_lea.hbm %s129_s1, 128 }
  0x89   :  { %p78_p13 = scmp.ne.s32.totalorder %s129_s1, %s77_s0  ;;  %p81_p0 = scmp.lt.u32.totalorder %s77_s0, %s129_s1 }
  0x8b   :  { %p83_p1 = pnand %p81_p0, %p78_p13 }
  0x8d   :  { %86 = shalt.err (!%p83_p1)
}
  0x8e   :  { %34 = dma.vmem_to_hbm [thread:$0]  %s32_s20, 128, %s129_s1, [#allocation4]  }
  0x8f   :  { %89 = dma.done.wait [#allocation4], 128  }
  0x90   :  { %90 = vsyncadd [#allocation4], 4294967168 }
  0x91   :  { %38 = vsyncpa [#allocation3], 1 }
  0x92   :  { %39 = vsyncpa [#allocation4], 1 }

</bundles_post_ra>
